<compile_context>
chip_gen: v7x
topology: tpu7x:2x2x1
jax: 0.10.0
libtpu: 0.0.40
codegen_flags: <defaults>
</compile_context>

<pallas_src>
import functools

import jax
import jax.numpy as jnp
from jax.experimental import pallas as pl
from jax.experimental.pallas import tpu as pltpu

_LANES = 128
_SUBLANES = 8

# Scoped-VMEM ceiling requested from Mosaic: <= default on v6e/v7x, an explicit
# raise over v5e's 16 MiB default, and comfortably under v7x's 64 MiB physical.
_VMEM_LIMIT_BYTES = 32 * 1024 * 1024
# Tile-height budget: double-buffered native-dtype inputs + ~2 live f32 block
# temporaries; leaves ~8 MiB slack under _VMEM_LIMIT_BYTES for output buffers
# and Mosaic internal scratch.
_VMEM_TILE_BUDGET_BYTES = 24 * 1024 * 1024
_TEMP_F32_BLOCKS = 2

# Below this element count, kernel dispatch + the separate partials reduce
# dominate; a plain fused-XLA reduction is strictly faster.
_MIN_KERNEL_ELEMS = 1 << 16


def _charbonnier_block_kernel(x_ref, y_ref, o_ref, *, eps, valid_rows_last):
    """One (block_rows, 128) tile -> one (8, 128) vreg-shaped partial sum."""
    xv = x_ref[...].astype(jnp.float32)
    yv = y_ref[...].astype(jnp.float32)
    d = xv - yv
    v = jnp.sqrt(d * d + jnp.float32(eps))

    br = v.shape[0]
    if valid_rows_last != br:
        # Ragged final block: rows >= valid_rows_last on the last grid step hold
        # unspecified (padded) data -> zero them before reducing.  Static bounds,
        # so this branch is compiled in only when raggedness actually exists.
        is_last = pl.program_id(0) == pl.num_programs(0) - 1
        limit = jnp.where(is_last, valid_rows_last, br)
        row = jax.lax.broadcasted_iota(jnp.int32, v.shape, 0)
        v = jnp.where(row < limit, v, jnp.float32(0.0))

    # Reduce rows -> (8, 128) with VPU adds only (no per-step cross-lane XLU
    # work).  Two-stage reduction keeps the add chain short enough to stay
    # hidden under the block's DMA even for large tiles.
    if br % 64 == 0:
        partial = v.reshape(8, br // 64, 8, _LANES).sum(axis=1).sum(axis=0)
    else:  # wrapper guarantees br is a multiple of 8
        partial = v.reshape(br // 8, 8, _LANES).sum(axis=0)

    o_ref[...] = partial[None]  # (1, 8, 128) block of the partials output


def _pick_block_rows(itemsize_x, itemsize_y):
    """Tile height from the VMEM byte budget; scales up for narrow dtypes."""
    bytes_per_row = _LANES * (2 * (itemsize_x + itemsize_y) + 4 * _TEMP_F32_BLOCKS)
    return max(_SUBLANES, _VMEM_TILE_BUDGET_BYTES // bytes_per_row)


def charbonnier_loss(x, y, sum_mode=True, eps=1e-6, *, block_rows=None,
                     min_kernel_elems=_MIN_KERNEL_ELEMS):
    """Pallas implementation of CharbonnierLoss.forward(x, y)."""
    assert x.shape == y.shape, "x and y must have the same shape"
    n = x.size
    isx = jnp.dtype(x.dtype).itemsize
    isy = jnp.dtype(y.dtype).itemsize
    sub = max(_SUBLANES, 32 // max(min(isx, isy), 1))  # sublane packing granularity
    rows = n // _LANES

    use_kernel = (n % _LANES == 0) and (rows >= sub) and (n >= min_kernel_elems)
    if not use_kernel:
        # Small or lane-unaligned inputs: XLA's fused elementwise+reduce is a
        # single HBM pass; a Pallas path here would need a padded relayout copy.
        d = x.astype(jnp.float32) - y.astype(jnp.float32)
        total = jnp.sum(jnp.sqrt(d * d + jnp.float32(eps)))
        return total if sum_mode else total / jnp.float32(n)

    if block_rows is None:
        block_rows = _pick_block_rows(isx, isy)
    br = min(int(block_rows), rows)
    br = max(sub, (br // sub) * sub)

    num_blocks = (rows + br - 1) // br
    valid_rows_last = rows - (num_blocks - 1) * br  # static; == br when divisible

    # Lane-dense view.  When the trailing-dim product is a multiple of 128
    # (e.g. 16x16 spatial) this collapse is layout-preserving (no HBM copy).
    x2 = x.reshape(rows, _LANES)
    y2 = y.reshape(rows, _LANES)

    kernel = functools.partial(_charbonnier_block_kernel, eps=eps,
                               valid_rows_last=valid_rows_last)
    bytes_accessed = n * (isx + isy) + num_blocks * _SUBLANES * _LANES * 4

    partials = pl.pallas_call(
        kernel,
        out_shape=jax.ShapeDtypeStruct((num_blocks, _SUBLANES, _LANES), jnp.float32),
        grid_spec=pltpu.PrefetchScalarGridSpec(
            num_scalar_prefetch=0,
            grid=(num_blocks,),
            in_specs=[
                pl.BlockSpec((br, _LANES), lambda i: (i, 0)),
                pl.BlockSpec((br, _LANES), lambda i: (i, 0)),
            ],
            out_specs=pl.BlockSpec((1, _SUBLANES, _LANES), lambda i: (i, 0, 0)),
        ),
        compiler_params=pltpu.CompilerParams(
            # No loop-carried state -> grid can shard across both TensorCores
            # on v7x; near-neutral on single-TC v5e/v6e.
            dimension_semantics=("parallel",),
            vmem_limit_bytes=_VMEM_LIMIT_BYTES,
        ),
        cost_estimate=pl.CostEstimate(
            flops=4 * n,
            transcendentals=n,
            bytes_accessed=int(bytes_accessed),
        ),
    )(x2, y2)

    # TODO(synk): on single-TC chips an in-kernel (8,128) accumulator with an
    # "arbitrary" grid would drop this second (tiny) reduce launch; kept as the
    # parallel-partials form so v7x's two TensorCores can share the grid.
    total = jnp.sum(partials, dtype=jnp.float32)
    return total if sum_mode else total / jnp.float32(n)


def _reference(x, y, sum_mode=True, eps=1e-6):
    diff = x.astype(jnp.float32) - y.astype(jnp.float32)
    v = jnp.sqrt(diff * diff + jnp.float32(eps))
    return jnp.sum(v) if sum_mode else jnp.mean(v)


if __name__ == "__main__":
    key = jax.random.PRNGKey(0)
    kx, ky = jax.random.split(key)

    # 1) Lane-aligned NCHW case, kernel path forced (small demo shape).
    shape = (2, 4, 16, 16)  # 2048 elements -> 16 lane-rows
    x = jax.random.normal(kx, shape, dtype=jnp.float32)
    y = jax.random.normal(ky, shape, dtype=jnp.float32)

    loss_sum = jax.block_until_ready(
        charbonnier_loss(x, y, sum_mode=True, min_kernel_elems=0))
    loss_mean = jax.block_until_ready(
        charbonnier_loss(x, y, sum_mode=False, min_kernel_elems=0))
    ref_sum = _reference(x, y, sum_mode=True)
    ref_mean = _reference(x, y, sum_mode=False)
    assert jnp.allclose(loss_sum, ref_sum, rtol=1e-5, atol=1e-4), (loss_sum, ref_sum)
    assert jnp.allclose(loss_mean, ref_mean, rtol=1e-5, atol=1e-6), (loss_mean, ref_mean)

    # 2) Ragged block count (rows=24, block_rows=16) -> exercises the in-kernel
    #    iota mask on the padded final grid step.
    shape_r = (2, 4, 24, 16)
    xr = jax.random.normal(kx, shape_r, dtype=jnp.float32)
    yr = jax.random.normal(ky, shape_r, dtype=jnp.float32)
    loss_r = jax.block_until_ready(
        charbonnier_loss(xr, yr, sum_mode=True, block_rows=16, min_kernel_elems=0))
    ref_r = _reference(xr, yr, sum_mode=True)
    assert jnp.allclose(loss_r, ref_r, rtol=1e-5, atol=1e-4), (loss_r, ref_r)

    # 3) bf16 inputs (native-dtype streaming + in-kernel f32 cast).
    shape_b = (4, 4, 32, 16)  # 8192 elements -> 64 lane-rows
    xb = jax.random.normal(kx, shape_b, dtype=jnp.bfloat16)
    yb = jax.random.normal(ky, shape_b, dtype=jnp.bfloat16)
    loss_b = jax.block_until_ready(
        charbonnier_loss(xb, yb, sum_mode=True, block_rows=16, min_kernel_elems=0))
    ref_b = _reference(xb, yb, sum_mode=True)
    assert jnp.allclose(loss_b, ref_b, rtol=1e-4, atol=1e-2), (loss_b, ref_b)

    # 4) Non-128-multiple element count -> fused-XLA fallback path.
    shape2 = (2, 3, 17, 19)
    x2 = jax.random.normal(kx, shape2, dtype=jnp.float32)
    y2 = jax.random.normal(ky, shape2, dtype=jnp.float32)
    loss2 = jax.block_until_ready(charbonnier_loss(x2, y2, sum_mode=True))
    ref2 = _reference(x2, y2, sum_mode=True)
    assert jnp.allclose(loss2, ref2, rtol=1e-5, atol=1e-4), (loss2, ref2)

    # 5) Default small-input fast path (same inputs as case 1, no overrides).
    loss_fast = jax.block_until_ready(charbonnier_loss(x, y, sum_mode=True))
    assert jnp.allclose(loss_fast, ref_sum, rtol=1e-5, atol=1e-4), (loss_fast, ref_sum)

    print("KERNEL_OK")
</pallas_src>

<mosaic_0001>
module attributes {stable_mosaic.version = 11 : i64} {
  func.func @_charbonnier_block_kernel(%arg0: i32, %arg1: memref<16x128xf32, #tpu.memory_space<vmem>>, %arg2: memref<16x128xf32, #tpu.memory_space<vmem>>, %arg3: memref<1x8x128xf32, #tpu.memory_space<vmem>>) attributes {dimension_semantics = [#tpu.dimension_semantics<parallel>], iteration_bounds = array<i64: 1>, scalar_prefetch = 0 : i64, scratch_operands = 0 : i64, tpu.core_type = #tpu.core_type<tc>, window_params = [{transform_indices = @transform_0, window_bounds = array<i64: 16, 128>}, {transform_indices = @transform_1, window_bounds = array<i64: 16, 128>}, {transform_indices = @transform_2, window_bounds = array<i64: 1, 8, 128>}]} {
    %c0 = arith.constant 0 : index
    %c0_0 = arith.constant 0 : index
    %0 = vector.load %arg1[%c0, %c0_0] : memref<16x128xf32, #tpu.memory_space<vmem>>, vector<16x128xf32>
    %c0_1 = arith.constant 0 : index
    %c0_2 = arith.constant 0 : index
    %1 = vector.load %arg2[%c0_1, %c0_2] : memref<16x128xf32, #tpu.memory_space<vmem>>, vector<16x128xf32>
    %2 = arith.subf %0, %1 : vector<16x128xf32>
    %3 = arith.mulf %2, %2 : vector<16x128xf32>
    %cst = arith.constant 9.99999997E-7 : f32
    %4 = vector.broadcast %cst : f32 to vector<16x128xf32>
    %5 = arith.addf %3, %4 : vector<16x128xf32>
    %6 = math.sqrt %5 : vector<16x128xf32>
    %7 = vector.shape_cast %6 : vector<16x128xf32> to vector<2x8x128xf32>
    %cst_3 = arith.constant dense<0.000000e+00> : vector<8x128xf32>
    %8 = vector.multi_reduction <add>, %7, %cst_3 [0] : vector<2x8x128xf32> to vector<8x128xf32>
    %9 = vector.shape_cast %8 : vector<8x128xf32> to vector<1x8x128xf32>
    %c0_4 = arith.constant 0 : index
    %c0_5 = arith.constant 0 : index
    %c0_6 = arith.constant 0 : index
    %10 = vector.load %arg3[%c0_4, %c0_5, %c0_6] : memref<1x8x128xf32, #tpu.memory_space<vmem>>, vector<1x8x128xf32>
    tpu.vector_store %arg3[%c0_4, %c0_5, %c0_6], %9 {strides = array<i32>} : memref<1x8x128xf32, #tpu.memory_space<vmem>>, vector<1x8x128xf32>,
    return
  }
  func.func @transform_0(%arg0: i32) -> (i32, i32) {
    %c0_i32 = arith.constant 0 : i32
    %c0_i32_0 = arith.constant 0 : i32
    return %arg0, %c0_i32 : i32, i32
  }
  func.func @transform_1(%arg0: i32) -> (i32, i32) {
    %c0_i32 = arith.constant 0 : i32
    %c0_i32_0 = arith.constant 0 : i32
    return %arg0, %c0_i32 : i32, i32
  }
  func.func @transform_2(%arg0: i32) -> (i32, i32, i32) {
    %c0_i32 = arith.constant 0 : i32
    %c0_i32_0 = arith.constant 0 : i32
    %c0_i32_1 = arith.constant 0 : i32
    return %arg0, %c0_i32, %c0_i32_0 : i32, i32, i32
  }
}

</mosaic_0001>

<bundles_post_ra>
// kernel: tpu_custom_call.1
= control target key start
LH: loop header
LB: loop body
LE: loop exit
PB: predicated region body
PF: predicated region fallthrough
CT: control target
= control target key end

     0   :  { %7 = vsyncpa [#allocation3], 0  ;;  %s219_s0 = inlined_call_operand.hbm [shape: f32[16,128], index: 0, kind: input, shape index: {}]   ;;  %s220_s1 = inlined_call_operand.hbm [shape: f32[16,128], index: 1, kind: input, shape index: {}]   ;;  %s221_s2 = inlined_call_operand.hbm [shape: f32[1,8,128], index: 2, kind: output, shape index: {}]  }
   0x1   :  { %8 = vsyncpa [#allocation6], 0 }
   0x2   :  { %9 = vsyncpa [#allocation4], 0  ;;  %s163_s9 = smov [#allocation2]   ;;  %s91_s13 = scalar_lea.hbm %s219_s0, 256 }
   0x3   :  { %s15_s10 = sshll.u32 %s163_s9, 4  ;;  %p92_p0 = scmp.ne.s32.totalorder %s219_s0, %s91_s13  ;;  %s16_s10 = int_to_ptr.vmem [resolvable:$true] %s15_s10 }
   0x4   :  { %p95_p1 = scmp.lt.u32.totalorder %s91_s13, %s219_s0 }
   0x6   :  { %p97_p2 = pnand %p95_p1, %p92_p0 }
   0x8   :  { %100 = shalt.err (!%p97_p2)
}
   0x9   :  { %s101_s18 = scalar_lea.vmem %s16_s10, 256  ;;  %p106_p4 = scmp.lt.s32.totalorder %s16_s10, %s16_s10 }
   0xa   :  { %p102_p3 = scmp.ne.s32.totalorder %s16_s10, %s101_s18  ;;  %p107_p5 = scmp.lt.s32.totalorder %s101_s18, %s101_s18 }
   0xc   :  { %p108_p6 = por %p107_p5, %p106_p4 }
   0xe   :  { %p109_p7 = pnand %p108_p6, %p102_p3 }
  0x10   :  { %112 = shalt.err (!%p109_p7)
}
  0x11   :  { %s164_s19 = smov 128   ;;  %s165_s20 = smov 8  }
  0x12   :  { %21 = dma.hbm_to_vmem [thread:$0]  %s219_s0, 256, %s16_s10, [#allocation3], %s164_s19, %s164_s19, %s165_s20  }
  0x13   :  { %s166_s23 = smov [#allocation5]   ;;  %s113_s27 = scalar_lea.hbm %s220_s1, 256 }
  0x14   :  { %s27_s24 = sshll.u32 %s166_s23, 4  ;;  %p114_p8 = scmp.ne.s32.totalorder %s220_s1, %s113_s27  ;;  %s28_s24 = int_to_ptr.vmem [resolvable:$true] %s27_s24 }
  0x15   :  { %p117_p9 = scmp.lt.u32.totalorder %s113_s27, %s220_s1 }
  0x17   :  { %p119_p10 = pnand %p117_p9, %p114_p8 }
  0x19   :  { %122 = shalt.err (!%p119_p10)
}
  0x1a   :  { %s123_s4 = scalar_lea.vmem %s28_s24, 256  ;;  %p128_p12 = scmp.lt.s32.totalorder %s28_s24, %s28_s24 }
  0x1b   :  { %p124_p11 = scmp.ne.s32.totalorder %s28_s24, %s123_s4  ;;  %p129_p13 = scmp.lt.s32.totalorder %s123_s4, %s123_s4 }
  0x1d   :  { %p130_p0 = por %p129_p13, %p128_p12 }
  0x1f   :  { %p131_p1 = pnand %p130_p0, %p124_p11 }
  0x21   :  { %134 = shalt.err (!%p131_p1)
}
  0x22   :  { %33 = dma.hbm_to_vmem [thread:$0]  %s220_s1, 256, %s28_s24, [#allocation6], %s164_s19, %s164_s19, %s165_s20  }
  0x23   :  { %157 = dma.done.wait [#allocation3], 256  }
  0x24   :  { %158 = vsyncadd [#allocation3], 4294967040 }
  0x25   :  { %159 = dma.done.wait [#allocation6], 256  }
  0x26   :  { %160 = vsyncadd [#allocation6], 4294967040  ;;  %v40_v0 = vld [vmem:[#allocation2] sm:$0xff]  ;;  %v41_v1 = vld [vmem:[#allocation2 + $0x8] sm:$0xff]  ;;  %s167_s1 = smov [#allocation7]  }
  0x27   :  { %v42_v2 = vld [vmem:[#allocation5] sm:$0xff]  ;;  %v43_v3 = vld [vmem:[#allocation5 + $0x8] sm:$0xff]  ;;  %s72_s6 = sshll.u32 %s167_s1, 4  ;;  %s73_s6 = int_to_ptr.vmem [resolvable:$true] %s72_s6 }
  0x28   :  { %v44_v4 = vsub.f32 %v40_v0, %v42_v2  ;;  %v45_v5 = vsub.f32 %v41_v1, %v43_v3  ;;  %s135_s7 = scalar_lea.vmem %s73_s6, 128  ;;  %p140_p3 = scmp.lt.s32.totalorder %s73_s6, %s73_s6 }
  0x29   :  { %p136_p2 = scmp.ne.s32.totalorder %s73_s6, %s135_s7  ;;  %p141_p4 = scmp.lt.s32.totalorder %s135_s7, %s135_s7 }
  0x2a   :  { %v46_v6 = vmul.f32 %v44_v4, %v44_v4  ;;  %v47_v7 = vmul.f32 %v45_v5, %v45_v5 }
  0x2b   :  { %p142_p5 = por %p141_p4, %p140_p3 }
  0x2c   :  { %v48_v8 = vadd.f32 1e-06, %v46_v6  ;;  %v49_v9 = vadd.f32 1e-06, %v47_v7 }
  0x2d   :  { %p143_p6 = pnand %p142_p5, %p136_p2 }
  0x2e   :  { %87 = vrsqrt.f32 %v48_v8  ;;  %vm52_vm0 = vcmp.eq.f32.partialorder %v48_v8, inf  ;;  %v55_v11 = vand.u32 2147483648, %v48_v8  ;;  %vm54_vm1 = vcmp.eq.f32.partialorder %v48_v8, 0.0 }
  0x2f   :  { %89 = vrsqrt.f32 %v49_v9  ;;  %vm59_vm2 = vcmp.eq.f32.partialorder %v49_v9, inf  ;;  %v62_v14 = vand.u32 2147483648, %v49_v9  ;;  %vm61_vm3 = vcmp.eq.f32.partialorder %v49_v9, 0.0 }
  0x38   :  { %v88_v10 = vpop.eup %87 }
  0x39   :  { %v90_v12 = vpop.eup %89  ;;  %v51_v13 = vmul.f32 %v88_v10, %v48_v8 }
  0x3a   :  { %v58_v15 = vmul.f32 %v90_v12, %v49_v9 }
  0x3b   :  { %v53_v16 = vsel %vm52_vm0, %v48_v8, %v51_v13 }
  0x3c   :  { %v56_v17 = vsel %vm54_vm1, %v55_v11, %v53_v16  ;;  %v60_v18 = vsel %vm59_vm2, %v49_v9, %v58_v15 }
  0x3d   :  { %v63_v19 = vsel %vm61_vm3, %v62_v14, %v60_v18 }
  0x3e   :  { %v64_v20 = vadd.f32 %v63_v19, %v56_v17 }
  0x40   :  { %65 = vst [vmem:[#allocation7] sm:$0xff] %v64_v20 }
  0x41   :  { %146 = shalt.err (!%p143_p6)
}
  0x42   :  { %s147_s10 = scalar_lea.hbm %s221_s2, 128 }
  0x43   :  { %p148_p7 = scmp.ne.s32.totalorder %s221_s2, %s147_s10  ;;  %p151_p8 = scmp.lt.u32.totalorder %s147_s10, %s221_s2 }
  0x45   :  { %p153_p9 = pnand %p151_p8, %p148_p7 }
  0x47   :  { %156 = shalt.err (!%p153_p9)
}
  0x48   :  { %75 = dma.vmem_to_hbm [thread:$0]  %s73_s6, 128, %s221_s2, [#allocation4]  }
  0x49   :  { %161 = dma.done.wait [#allocation4], 128  }
  0x4a   :  { %162 = vsyncadd [#allocation4], 4294967168 }
  0x4b   :  { %79 = vsyncpa [#allocation3], 1 }
  0x4c   :  { %80 = vsyncpa [#allocation6], 1 }
  0x4d   :  { %81 = vsyncpa [#allocation4], 1 }

</bundles_post_ra>
